<compile_context>
chip_gen: v7x
topology: tpu7x:2x2x1
jax: 0.10.0
libtpu: 0.0.40
codegen_flags: <defaults>
</compile_context>

<pallas_src>
import jax
import jax.numpy as jnp
from jax.experimental import pallas as pl
from jax.experimental.pallas import tpu as pltpu

IN_FEATURES = 1024


def _make_kernel(sign, hw_valid, tile_hw, needs_mask):
    """Build the kernel; mode sign and remainder-mask config are baked in."""

    def kernel(x_ref, w_ref, b_ref, out_ref):
        # x_ref:   (1024, tile_hw) VMEM -- channel-major slab of one batch image
        # w_ref:   (1, 1024)       VMEM -- fc1 weight
        # b_ref:   (1,)            SMEM -- fc1 bias
        # out_ref: (1, 1, 1)       VMEM -- per-batch running loss sum (accumulator)
        t = pl.program_id(1)

        @pl.when(t == 0)
        def _():
            out_ref[...] = jnp.zeros_like(out_ref)

        # fc1 as w[1,C] @ x[C,T] -> lane-dense (1, T) logits (no transposes).
        z = jnp.dot(w_ref[...], x_ref[...], preferred_element_type=jnp.float32)
        z = z + b_ref[0]
        s = jax.nn.sigmoid(z)

        # BCEWithLogitsLoss applied to the already-sigmoided value:
        #   label 0 ('source'): softplus(+s);  label 1 ('target'): softplus(-s)
        loss = jnp.log1p(jnp.exp(sign * s))          # s in (0,1): no overflow
        if needs_mask:
            col = t * tile_hw + jax.lax.broadcasted_iota(jnp.int32, z.shape, 1)
            loss = jnp.where(col < hw_valid, loss, 0.0)
        out_ref[...] += jnp.sum(loss)

    return kernel


def local_discriminator_loss(x, w, b, mode, *, max_tile_hw=512):
    """loss = LocalDiscriminator().forward(x, mode) with fc1 weight w, bias b."""
    if mode not in ("source", "target"):
        raise ValueError("wrong Mode....")
    B, C, H, W = x.shape
    assert C == IN_FEATURES, "fc1 expects 1024 input features"
    assert H == W, "module indexes j with x.shape[2]; assume square spatial dims"
    sign = 1.0 if mode == "source" else -1.0

    HW = H * W
    # Free layout change: NCHW -> [B*C, HW]. Contraction over C per batch image,
    # spatial positions along lanes. No transpose, no dtype upcast.
    xm = x.reshape(B * C, HW)
    wv = w.reshape(1, C).astype(x.dtype)
    bv = b.reshape(1).astype(jnp.float32)

    if HW <= max_tile_hw:
        tile = HW                         # full-extent last dim: no 128 constraint
        hw_pad = HW
    else:
        tile = max_tile_hw
        assert tile % 128 == 0, "large tiles must be lane-aligned"
        hw_pad = ((HW + tile - 1) // tile) * tile
        if hw_pad != HW:
            xm = jnp.pad(xm, ((0, 0), (0, hw_pad - HW)))
    needs_mask = hw_pad != HW
    n_tiles = hw_pad // tile

    kernel = _make_kernel(sign, HW, tile, needs_mask)

    partial = pl.pallas_call(
        kernel,
        out_shape=jax.ShapeDtypeStruct((B, 1, 1), jnp.float32),
        grid_spec=pltpu.PrefetchScalarGridSpec(
            num_scalar_prefetch=0,
            grid=(B, n_tiles),
            in_specs=[
                pl.BlockSpec((C, tile), lambda bi, ti: (bi, ti)),   # x slab
                pl.BlockSpec((1, C), lambda bi, ti: (0, 0)),        # fc1 weight
                pl.BlockSpec(memory_space=pltpu.SMEM),              # fc1 bias
            ],
            out_specs=pl.BlockSpec((1, 1, 1), lambda bi, ti: (bi, 0, 0)),
        ),
        compiler_params=pltpu.CompilerParams(
            dimension_semantics=("parallel", "arbitrary")),          # batch x, reduce hw
    )(xm, wv, bv)

    # Each BCE call averages over B elements; outer division by H*H -> sum/(B*H*H).
    return jnp.sum(partial) / (B * H * H)


def _reference_loss(x, w, b, mode):
    # Pure-JAX reference for correctness checking.
    B, C, H, W = x.shape
    xm = jnp.transpose(x, (0, 2, 3, 1)).reshape(B * H * W, C).astype(jnp.float32)
    s = jax.nn.sigmoid(xm @ w.reshape(C, 1).astype(jnp.float32) + b.astype(jnp.float32))
    t = s if mode == "source" else -s
    return jnp.sum(jnp.log1p(jnp.exp(t))) / (B * H * H)


if __name__ == "__main__":
    key = jax.random.PRNGKey(0)
    kx, kw, kb, kx2 = jax.random.split(key, 4)

    # Deterministic nn.Linear(1024, 1)-style init: U(-1/sqrt(1024), 1/sqrt(1024)).
    bound = 1.0 / (IN_FEATURES ** 0.5)
    w = jax.random.uniform(kw, (1, IN_FEATURES), minval=-bound, maxval=bound,
                           dtype=jnp.float32)
    b = jax.random.uniform(kb, (1,), minval=-bound, maxval=bound, dtype=jnp.float32)

    # Small shape (single full-extent spatial tile path).
    B, H = 2, 4
    x = jax.random.normal(kx, (B, IN_FEATURES, H, H), dtype=jnp.float32)
    for mode in ("source", "target"):
        got = local_discriminator_loss(x, w, b, mode)
        jax.block_until_ready(got)
        ref = _reference_loss(x, w, b, mode)
        assert jnp.allclose(got, ref, rtol=1e-5, atol=1e-6), (mode, got, ref)

    # Shape exercising the tiled + padded + masked remainder path (H*H=529 > 512).
    H2 = 23
    x2 = jax.random.normal(kx2, (B, IN_FEATURES, H2, H2), dtype=jnp.float32)
    for mode in ("source", "target"):
        got = local_discriminator_loss(x2, w, b, mode)
        jax.block_until_ready(got)
        ref = _reference_loss(x2, w, b, mode)
        assert jnp.allclose(got, ref, rtol=1e-5, atol=1e-6), (mode, got, ref)

    print("KERNEL_OK")
</pallas_src>

<mosaic_0001>
module attributes {stable_mosaic.version = 11 : i64} {
  func.func @kernel(%arg0: i32, %arg1: i32, %arg2: memref<1024x16xf32, #tpu.memory_space<vmem>>, %arg3: memref<1x1024xf32, #tpu.memory_space<vmem>>, %arg4: memref<1xf32, #tpu.memory_space<smem>>, %arg5: memref<1x1x1xf32, #tpu.memory_space<vmem>>) attributes {dimension_semantics = [#tpu.dimension_semantics<parallel>, #tpu.dimension_semantics<arbitrary>], iteration_bounds = array<i64: 2, 1>, scalar_prefetch = 0 : i64, scratch_operands = 0 : i64, tpu.core_type = #tpu.core_type<tc>, window_params = [{transform_indices = @transform_0, window_bounds = array<i64: 1024, 16>}, {pipeline_mode = #tpu.pipeline_mode<synchronous>, transform_indices = @transform_1, window_bounds = array<i64: 1, 1024>}, {transform_indices = @transform_2, window_bounds = array<i64: 1>}, {transform_indices = @transform_3, window_bounds = array<i64: 1, 1, 1>}]} {
    %c0_i32 = arith.constant 0 : i32
    %0 = arith.cmpi eq, %arg1, %c0_i32 : i32
    %1 = arith.extui %0 : i1 to i32
    %c0_i32_0 = arith.constant 0 : i32
    %2 = arith.cmpi ne, %1, %c0_i32_0 : i32
    scf.if %2 {
      %cst_14 = arith.constant 0.000000e+00 : f32
      %26 = vector.broadcast %cst_14 : f32 to vector<1x1x1xf32>
      %c0_15 = arith.constant 0 : index
      %c0_16 = arith.constant 0 : index
      %c0_17 = arith.constant 0 : index
      %27 = vector.load %arg5[%c0_15, %c0_16, %c0_17] : memref<1x1x1xf32, #tpu.memory_space<vmem>>, vector<1x1x1xf32>
      tpu.vector_store %arg5[%c0_15, %c0_16, %c0_17], %26 {strides = array<i32>} : memref<1x1x1xf32, #tpu.memory_space<vmem>>, vector<1x1x1xf32>,
    } else {
    }
    %c0 = arith.constant 0 : index
    %c0_1 = arith.constant 0 : index
    %3 = vector.load %arg3[%c0, %c0_1] : memref<1x1024xf32, #tpu.memory_space<vmem>>, vector<1x1024xf32>
    %c0_2 = arith.constant 0 : index
    %c0_3 = arith.constant 0 : index
    %4 = vector.load %arg2[%c0_2, %c0_3] : memref<1024x16xf32, #tpu.memory_space<vmem>>, vector<1024x16xf32>
    %cst = arith.constant dense<0.000000e+00> : vector<1x16xf32>
    %5 = tpu.matmul %3, %4, %cst {dimension_numbers = #tpu.dot_dimension_numbers<[1], [0], [0], [1], [0, 0, 1, 1], [], []>} : vector<1x1024xf32>, vector<1024x16xf32>, vector<1x16xf32> -> vector<1x16xf32>
    %c0_4 = arith.constant 0 : index
    %6 = memref.load %arg4[%c0_4] : memref<1xf32, #tpu.memory_space<smem>>
    %7 = vector.broadcast %6 : f32 to vector<1x16xf32>
    %8 = arith.addf %5, %7 : vector<1x16xf32>
    %9 = arith.negf %8 : vector<1x16xf32>
    %10 = math.exp %9 : vector<1x16xf32>
    %cst_5 = arith.constant 1.000000e+00 : f32
    %11 = vector.broadcast %cst_5 : f32 to vector<1x16xf32>
    %12 = arith.addf %11, %10 : vector<1x16xf32>
    %13 = arith.divf %11, %12 : vector<1x16xf32>
    %cst_6 = arith.constant 1.000000e+00 : f32
    %14 = vector.broadcast %cst_6 : f32 to vector<1x16xf32>
    %15 = arith.mulf %14, %13 : vector<1x16xf32>
    %16 = math.exp %15 : vector<1x16xf32>
    %17 = math.log1p %16 : vector<1x16xf32>
    %c0_7 = arith.constant 0 : index
    %c0_8 = arith.constant 0 : index
    %c0_9 = arith.constant 0 : index
    %18 = vector.load %arg5[%c0_7, %c0_8, %c0_9] : memref<1x1x1xf32, #tpu.memory_space<vmem>>, vector<1x1x1xf32>
    %19 = vector.shape_cast %17 : vector<1x16xf32> to vector<1x1x16xf32>
    %cst_10 = arith.constant dense<0.000000e+00> : vector<1xf32>
    %20 = vector.multi_reduction <add>, %19, %cst_10 [1, 2] : vector<1x1x16xf32> to vector<1xf32>
    %21 = vector.shape_cast %20 : vector<1xf32> to vector<1x1x1xf32>
    %22 = vector.extract %21[0, 0, 0] : f32 from vector<1x1x1xf32>
    %23 = vector.broadcast %22 : f32 to vector<1x1x1xf32>
    %24 = arith.addf %18, %23 : vector<1x1x1xf32>
    %c0_11 = arith.constant 0 : index
    %c0_12 = arith.constant 0 : index
    %c0_13 = arith.constant 0 : index
    %25 = vector.load %arg5[%c0_11, %c0_12, %c0_13] : memref<1x1x1xf32, #tpu.memory_space<vmem>>, vector<1x1x1xf32>
    tpu.vector_store %arg5[%c0_11, %c0_12, %c0_13], %24 {strides = array<i32>} : memref<1x1x1xf32, #tpu.memory_space<vmem>>, vector<1x1x1xf32>,
    return
  }
  func.func @transform_0(%arg0: i32, %arg1: i32) -> (i32, i32) {
    %c0_i32 = arith.constant 0 : i32
    return %arg0, %arg1 : i32, i32
  }
  func.func @transform_1(%arg0: i32, %arg1: i32) -> (i32, i32) {
    %c0_i32 = arith.constant 0 : i32
    %c0_i32_0 = arith.constant 0 : i32
    %c0_i32_1 = arith.constant 0 : i32
    return %c0_i32, %c0_i32_0 : i32, i32
  }
  func.func @transform_2(%arg0: i32, %arg1: i32) -> i32 {
    %c0_i32 = arith.constant 0 : i32
    %c0_i32_0 = arith.constant 0 : i32
    return %c0_i32 : i32
  }
  func.func @transform_3(%arg0: i32, %arg1: i32) -> (i32, i32, i32) {
    %c0_i32 = arith.constant 0 : i32
    %c0_i32_0 = arith.constant 0 : i32
    %c0_i32_1 = arith.constant 0 : i32
    return %arg0, %c0_i32, %c0_i32_0 : i32, i32, i32
  }
}

</mosaic_0001>

<bundles_post_ra>
// kernel: tpu_custom_call.1
= control target key start
LH: loop header
LB: loop body
LE: loop exit
PB: predicated region body
PF: predicated region fallthrough
CT: control target
= control target key end

     0   :  { %s1103_s14 = smov 0   ;;  %s1105_s15 = smov 0   ;;  %s1302_s0 = inlined_call_operand.vmem [shape: f32[2048,16], index: 0, kind: input, shape index: {}]   ;;  %s1303_s1 = inlined_call_operand.vmem [shape: f32[1,1024], index: 1, kind: input, shape index: {}]   ;;  %s1304_s2 = inlined_call_operand.<no memory space> [shape: f32[1], index: 2, kind: input, shape index: {}]   ;;  %s1305_s3 = inlined_call_operand.vmem [shape: f32[2,1,1], index: 3, kind: output, shape index: {}]  }
   0x1   :  { %8 = sst [smem:[#allocation2]] %s1304_s2  ;;  %s1107_s16 = smov 0  }
   0x2 LB: > { %s26_s2 = sadd.s32 1, %s1073_s15  ;;  %p746_p0 = scmp.ge.s32.totalorder %s1077_s16, 1  ;;  %s1077_s16 = sphi %s1107_s16, %s14_s16   ;;  %s1073_s15 = sphi %s1105_s15, %s1307_s15   ;;  %s1069_s14 = sphi %s1103_s14, %s1306_s14  }
   0x3   : > { %p28_p1 = scmp.ge.s32.totalorder %s26_s2, 2  ;;  %p156_p2 = scmp.lt.s32.totalorder %s1077_s16, 3 }
   0x5   : > { %s1309_s2 = smov (%p28_p1, %s26_s2), 0  ;;  %p157_p3 = pnand %p746_p0, %p156_p2 }
   0x6   : > { %s747_s17 = sshll.u32 (!%p157_p3), %s1069_s14, 7  ;;  %v331_v0 = vlaneseq (!%p157_p3)  ;;  %v1129_v2 = vld [vmem:[%s1303_s1] sm:$0xff] (!%p157_p3)  ;;  %s328_s24 = sld [smem:[#allocation2]] (!%p157_p3)  ;;  %vm669_vm0 = vcmask (!%p157_p3), 122880   ;;  %vm197_vm2 = vcmask (!%p157_p3), 0  }
   0x7   : > { %160 = sbr.rel (%p157_p3) target bundleno = 567 (0x237), region = 32  ;;  %p182_p4 = scmp.lt.s32.totalorder (!%p157_p3), %s747_s17, 255 }
   0x8   : > { %v1124_v1 = vshrl.u32 (!%p157_p3), %v331_v0, 7  ;;  %p190_p5 = scmp.lt.s32.totalorder (!%p157_p3), %s1069_s14, 1 }
   0xa   : > { %v337_v3 = vsub.s32 (!%p157_p3), 1, %v1124_v1  ;;  %v345_v4 = vsub.s32 (!%p157_p3), 3, %v1124_v1  ;;  %v349_v5 = vsub.s32 (!%p157_p3), 4, %v1124_v1  ;;  %v357_v6 = vsub.s32 (!%p157_p3), 6, %v1124_v1 }
   0xc   : > { %v338_v7 = vrot.slane (!%p157_p3), %v1129_v2, %v337_v3  ;;  %v346_v8 = vrot.slane (!%p157_p3), %v1129_v2, %v345_v4  ;;  %v1146_v12 = vrot.slane (!%p157_p3), %v1129_v2, %v349_v5  ;;  %v1149_v13 = vrot.slane (!%p157_p3), %v1129_v2, %v357_v6 }
   0xe   : > { %s1311_s17 = smov (!%p182_p4, %s747_s17), 255  ;;  %435 = vmatprep.mubr.f32.mxu0 %v338_v7  ;;  %505 = vmatprep.mubr.f32.mxu1 %v346_v8  ;;  %s1313_s14 = smov (!%p190_p5, %s1069_s14), 1 }
   0xf   : > { %s748_s20 = sshll.u32 %s1311_s17, 3  ;;  %s192_s27 = scalar_lea.vmem %s1305_s3, %s1313_s14 }
  0x10   : > { %s1138_s23 = scalar_lea.vmem %s1302_s0, %s748_s20 }
  0x11   : > { %v216_v9 = vld [vmem:[%s1138_s23 + $0x80] sm:$0xff]  ;;  %v217_v10 = vld [vmem:[%s1138_s23 + $0x88] sm:$0xff]  ;;  %v218_v22 = vld [vmem:[%s1138_s23 + $0x90] sm:$0xff] }
  0x12   : > { %v200_v11 = vld [vmem:[%s1138_s23] sm:$0xff]  ;;  %v892_v14 = vpack.c.bf16 %v217_v10, %v216_v9  ;;  %v201_v15 = vld [vmem:[%s1138_s23 + $0x8] sm:$0xff]  ;;  %v219_v24 = vld [vmem:[%s1138_s23 + $0x98] sm:$0xff] }
  0x13   : > { %v248_v16 = vld [vmem:[%s1138_s23 + $0x180] sm:$0xff]  ;;  %v249_v17 = vld [vmem:[%s1138_s23 + $0x188] sm:$0xff]  ;;  %v894_v18 = vpack.c.bf16 %v201_v15, %v200_v11  ;;  %v202_v25 = vld [vmem:[%s1138_s23 + $0x10] sm:$0xff]  ;;  %v896_v27 = vpack.c.bf16 %v219_v24, %v218_v22 }
  0x14   : > { %v924_v19 = vpack.c.bf16 %v249_v17, %v248_v16  ;;  %v232_v20 = vld [vmem:[%s1138_s23 + $0x100] sm:$0xff]  ;;  %v233_v21 = vld [vmem:[%s1138_s23 + $0x108] sm:$0xff]  ;;  %893 = vmatprep.subr.bf16.mxu0 %v892_v14  ;;  %v203_v26 = vld [vmem:[%s1138_s23 + $0x18] sm:$0xff] }
  0x15   : > { %v926_v23 = vpack.c.bf16 %v233_v21, %v232_v20  ;;  %895 = vmatpush3.bf16.msra.mxu0 %v894_v18  ;;  %v898_v28 = vpack.c.bf16 %v203_v26, %v202_v25  ;;  %v250_v29 = vld [vmem:[%s1138_s23 + $0x190] sm:$0xff]  ;;  %v251_v30 = vld [vmem:[%s1138_s23 + $0x198] sm:$0xff]  ;;  %v220_v34 = vld [vmem:[%s1138_s23 + $0xa0] sm:$0xff] }
  0x16   : > { %925 = vmatprep.subr.bf16.mxu1 %v924_v19  ;;  %v234_v31 = vld [vmem:[%s1138_s23 + $0x110] sm:$0xff]  ;;  %v928_v32 = vpack.c.bf16 %v251_v30, %v250_v29  ;;  %v235_v33 = vld [vmem:[%s1138_s23 + $0x118] sm:$0xff]  ;;  %v221_v35 = vld [vmem:[%s1138_s23 + $0xa8] sm:$0xff]  ;;  %897 = vmatprep.subr.bf16.mxu0 %v896_v27 }
  0x17   : > { %927 = vmatpush3.bf16.msra.mxu1 %v926_v23  ;;  %v930_v36 = vpack.c.bf16 %v235_v33, %v234_v31  ;;  %v900_v37 = vpack.c.bf16 %v221_v35, %v220_v34  ;;  %v204_v38 = vld [vmem:[%s1138_s23 + $0x20] sm:$0xff]  ;;  %v205_v39 = vld [vmem:[%s1138_s23 + $0x28] sm:$0xff]  ;;  %v222_v46 = vld [vmem:[%s1138_s23 + $0xb0] sm:$0xff] }
  0x18   : > { %v252_v40 = vld [vmem:[%s1138_s23 + $0x1a0] sm:$0xff]  ;;  %929 = vmatprep.subr.bf16.mxu1 %v928_v32  ;;  %v253_v41 = vld [vmem:[%s1138_s23 + $0x1a8] sm:$0xff]  ;;  %v902_v44 = vpack.c.bf16 %v205_v39, %v204_v38  ;;  %v223_v47 = vld [vmem:[%s1138_s23 + $0xb8] sm:$0xff] }
  0x19   : > { %v236_v42 = vld [vmem:[%s1138_s23 + $0x120] sm:$0xff]  ;;  %v237_v43 = vld [vmem:[%s1138_s23 + $0x128] sm:$0xff]  ;;  %899 = vmatpush3.bf16.msra.mxu0 %v898_v28  ;;  %v932_v45 = vpack.c.bf16 %v253_v41, %v252_v40  ;;  %v206_v48 = vld [vmem:[%s1138_s23 + $0x30] sm:$0xff]  ;;  %v904_v50 = vpack.c.bf16 %v223_v47, %v222_v46  ;;  %v333_v47 = vsub.s32 0, %v1124_v1 }
  0x1a   : > { %901 = vmatprep.subr.bf16.mxu0 %v900_v37  ;;  %v934_v49 = vpack.c.bf16 %v237_v43, %v236_v42  ;;  %v207_v51 = vld [vmem:[%s1138_s23 + $0x38] sm:$0xff]  ;;  %v254_v52 = vld [vmem:[%s1138_s23 + $0x1b0] sm:$0xff]  ;;  %v224_v57 = vld [vmem:[%s1138_s23 + $0xc0] sm:$0xff] }
  0x1b   : > { %931 = vmatpush3.bf16.msra.mxu1 %v930_v36  ;;  %v255_v53 = vld [vmem:[%s1138_s23 + $0x1b8] sm:$0xff]  ;;  %v238_v55 = vld [vmem:[%s1138_s23 + $0x130] sm:$0xff]  ;;  %v225_v58 = vld [vmem:[%s1138_s23 + $0xc8] sm:$0xff]  ;;  %v906_v59 = vpack.c.bf16 %v207_v51, %v206_v48  ;;  %v341_v51 = vsub.s32 2, %v1124_v1 }
  0x1c   : > { %933 = vmatprep.subr.bf16.mxu1 %v932_v45  ;;  %v936_v54 = vpack.c.bf16 %v255_v53, %v254_v52  ;;  %v239_v56 = vld [vmem:[%s1138_s23 + $0x138] sm:$0xff]  ;;  %v256_v60 = vld [vmem:[%s1138_s23 + $0x1c0] sm:$0xff]  ;;  %v257_v61 = vld [vmem:[%s1138_s23 + $0x1c8] sm:$0xff]  ;;  %v908_v63 = vpack.c.bf16 %v225_v58, %v224_v57 }
  0x1d   : > { %903 = vmatpush3.bf16.msra.mxu0 %v902_v44  ;;  %v938_v62 = vpack.c.bf16 %v239_v56, %v238_v55  ;;  %v208_v0 = vld [vmem:[%s1138_s23 + $0x40] sm:$0xff]  ;;  %v209_v3 = vld [vmem:[%s1138_s23 + $0x48] sm:$0xff]  ;;  %v940_v5 = vpack.c.bf16 %v257_v61, %v256_v60  ;;  %v226_v7 = vld [vmem:[%s1138_s23 + $0xd0] sm:$0xff]  ;;  %v353_v61 = vsub.s32 5, %v1124_v1 }
  0x1e   : > { %905 = vmatprep.subr.bf16.mxu0 %v904_v50  ;;  %v240_v4 = vld [vmem:[%s1138_s23 + $0x140] sm:$0xff]  ;;  %v241_v6 = vld [vmem:[%s1138_s23 + $0x148] sm:$0xff]  ;;  %v227_v8 = vld [vmem:[%s1138_s23 + $0xd8] sm:$0xff]  ;;  %v910_v11 = vpack.c.bf16 %v209_v3, %v208_v0  ;;  %v361_v3 = vsub.s32 7, %v1124_v1 }
  0x1f   : > { %935 = vmatpush3.bf16.msra.mxu1 %v934_v49  ;;  %v258_v9 = vld [vmem:[%s1138_s23 + $0x1d0] sm:$0xff]  ;;  %v259_v10 = vld [vmem:[%s1138_s23 + $0x1d8] sm:$0xff]  ;;  %v942_v14 = vpack.c.bf16 %v241_v6, %v240_v4  ;;  %v912_v15 = vpack.c.bf16 %v227_v8, %v226_v7  ;;  %v228_v21 = vld [vmem:[%s1138_s23 + $0xe0] sm:$0xff] }
  0x20   : > { %937 = vmatprep.subr.bf16.mxu1 %v936_v54  ;;  %v210_v16 = vld [vmem:[%s1138_s23 + $0x50] sm:$0xff]  ;;  %v211_v17 = vld [vmem:[%s1138_s23 + $0x58] sm:$0xff]  ;;  %v944_v19 = vpack.c.bf16 %v259_v10, %v258_v9  ;;  %v229_v22 = vld [vmem:[%s1138_s23 + $0xe8] sm:$0xff] }
  0x21   : > { %907 = vmatpush3.bf16.msra.mxu0 %v906_v59  ;;  %v242_v18 = vld [vmem:[%s1138_s23 + $0x150] sm:$0xff]  ;;  %v243_v20 = vld [vmem:[%s1138_s23 + $0x158] sm:$0xff]  ;;  %v260_v23 = vld [vmem:[%s1138_s23 + $0x1e0] sm:$0xff]  ;;  %v914_v25 = vpack.c.bf16 %v211_v17, %v210_v16  ;;  %v916_v27 = vpack.c.bf16 %v229_v22, %v228_v21  ;;  %v354_v16 = vrot.slane %v1129_v2, %v353_v61 }
  0x22   : > { %909 = vmatprep.subr.bf16.mxu0 %v908_v63  ;;  %v261_v24 = vld [vmem:[%s1138_s23 + $0x1e8] sm:$0xff]  ;;  %v946_v26 = vpack.c.bf16 %v243_v20, %v242_v18  ;;  %v212_v28 = vld [vmem:[%s1138_s23 + $0x60] sm:$0xff]  ;;  %v230_v33 = vld [vmem:[%s1138_s23 + $0xf0] sm:$0xff] }
  0x23   : > { %939 = vmatpush3.bf16.msra.mxu1 %v938_v62  ;;  %v213_v29 = vld [vmem:[%s1138_s23 + $0x68] sm:$0xff]  ;;  %v244_v30 = vld [vmem:[%s1138_s23 + $0x160] sm:$0xff]  ;;  %v948_v31 = vpack.c.bf16 %v261_v24, %v260_v23  ;;  %v231_v34 = vld [vmem:[%s1138_s23 + $0xf8] sm:$0xff]  ;;  %v334_v62 = vrot.slane %v1129_v2, %v333_v47 }
  0x24   : > { %941 = vmatprep.subr.bf16.mxu1 %v940_v5  ;;  %v245_v32 = vld [vmem:[%s1138_s23 + $0x168] sm:$0xff]  ;;  %v262_v35 = vld [vmem:[%s1138_s23 + $0x1f0] sm:$0xff]  ;;  %v263_v36 = vld [vmem:[%s1138_s23 + $0x1f8] sm:$0xff]  ;;  %v918_v37 = vpack.c.bf16 %v213_v29, %v212_v28  ;;  %v920_v39 = vpack.c.bf16 %v231_v34, %v230_v33  ;;  %v342_v5 = vrot.slane %v1129_v2, %v341_v51 }
  0x25   : > { %911 = vmatpush3.bf16.msra.mxu0 %v910_v11  ;;  %v950_v38 = vpack.c.bf16 %v245_v32, %v244_v30  ;;  %v214_v40 = vld [vmem:[%s1138_s23 + $0x70] sm:$0xff]  ;;  %v215_v41 = vld [vmem:[%s1138_s23 + $0x78] sm:$0xff]  ;;  %v952_v43 = vpack.c.bf16 %v263_v36, %v262_v35  ;;  %v280_v45 = vld [vmem:[%s1138_s23 + $0x280] sm:$0xff] }
  0x26   : > { %913 = vmatprep.subr.bf16.mxu0 %v912_v15  ;;  %v246_v42 = vld [vmem:[%s1138_s23 + $0x170] sm:$0xff]  ;;  %v247_v44 = vld [vmem:[%s1138_s23 + $0x178] sm:$0xff]  ;;  %v281_v46 = vld [vmem:[%s1138_s23 + $0x288] sm:$0xff]  ;;  %v922_v50 = vpack.c.bf16 %v215_v41, %v214_v40 }
  0x27   : > { %943 = vmatpush3.bf16.msra.mxu1 %v942_v14  ;;  %v312_v48 = vld [vmem:[%s1138_s23 + $0x380] sm:$0xff]  ;;  %v313_v49 = vld [vmem:[%s1138_s23 + $0x388] sm:$0xff]  ;;  %v954_v52 = vpack.c.bf16 %v247_v44, %v246_v42  ;;  %v956_v53 = vpack.c.bf16 %v281_v46, %v280_v45  ;;  %v282_v59 = vld [vmem:[%s1138_s23 + $0x290] sm:$0xff] }
  0x28   : > { %945 = vmatprep.subr.bf16.mxu1 %v944_v19  ;;  %v264_v54 = vld [vmem:[%s1138_s23 + $0x200] sm:$0xff]  ;;  %v265_v55 = vld [vmem:[%s1138_s23 + $0x208] sm:$0xff]  ;;  %v988_v57 = vpack.c.bf16 %v313_v49, %v312_v48  ;;  %v283_v60 = vld [vmem:[%s1138_s23 + $0x298] sm:$0xff]  ;;  %v362_v19 = vrot.slane %v1129_v2, %v361_v3 }
  0x29   : > { %915 = vmatpush3.bf16.msra.mxu0 %v914_v25  ;;  %v296_v56 = vld [vmem:[%s1138_s23 + $0x300] sm:$0xff]  ;;  %v297_v58 = vld [vmem:[%s1138_s23 + $0x308] sm:$0xff]  ;;  %v314_v63 = vld [vmem:[%s1138_s23 + $0x390] sm:$0xff]  ;;  %v958_v4 = vpack.c.bf16 %v265_v55, %v264_v54  ;;  %v960_v7 = vpack.c.bf16 %v283_v60, %v282_v59 }
  0x2a   : > { %917 = vmatprep.subr.bf16.mxu0 %v916_v27  ;;  %v315_v0 = vld [vmem:[%s1138_s23 + $0x398] sm:$0xff]  ;;  %v990_v6 = vpack.c.bf16 %v297_v58, %v296_v56  ;;  %v266_v8 = vld [vmem:[%s1138_s23 + $0x210] sm:$0xff]  ;;  %v284_v15 = vld [vmem:[%s1138_s23 + $0x2a0] sm:$0xff] }
  0x2b   : > { %947 = vmatpush3.bf16.msra.mxu1 %v946_v26  ;;  %v267_v9 = vld [vmem:[%s1138_s23 + $0x218] sm:$0xff]  ;;  %v298_v10 = vld [vmem:[%s1138_s23 + $0x310] sm:$0xff]  ;;  %v992_v11 = vpack.c.bf16 %v315_v0, %v314_v63  ;;  %v285_v1 = vld [vmem:[%s1138_s23 + $0x2a8] sm:$0xff] }
  0x2c   : > { %949 = vmatprep.subr.bf16.mxu1 %v948_v31  ;;  %v299_v14 = vld [vmem:[%s1138_s23 + $0x318] sm:$0xff]  ;;  %v316_v17 = vld [vmem:[%s1138_s23 + $0x3a0] sm:$0xff]  ;;  %v317_v18 = vld [vmem:[%s1138_s23 + $0x3a8] sm:$0xff]  ;;  %v962_v20 = vpack.c.bf16 %v267_v9, %v266_v8  ;;  %v964_v22 = vpack.c.bf16 %v285_v1, %v284_v15 }
  0x2d   : > { %919 = vmatpush3.bf16.msra.mxu0 %v918_v37  ;;  %v994_v21 = vpack.c.bf16 %v299_v14, %v298_v10  ;;  %v268_v23 = vld [vmem:[%s1138_s23 + $0x220] sm:$0xff]  ;;  %v269_v24 = vld [vmem:[%s1138_s23 + $0x228] sm:$0xff]  ;;  %v996_v26 = vpack.c.bf16 %v317_v18, %v316_v17  ;;  %v286_v28 = vld [vmem:[%s1138_s23 + $0x2b0] sm:$0xff] }
  0x2e   : > { %921 = vmatprep.subr.bf16.mxu0 %v920_v39  ;;  %v300_v25 = vld [vmem:[%s1138_s23 + $0x320] sm:$0xff]  ;;  %v301_v27 = vld [vmem:[%s1138_s23 + $0x328] sm:$0xff]  ;;  %v287_v2 = vld [vmem:[%s1138_s23 + $0x2b8] sm:$0xff]  ;;  %v966_v31 = vpack.c.bf16 %v269_v24, %v268_v23 }
  0x2f   : > { %951 = vmatpush3.bf16.msra.mxu1 %v950_v38  ;;  %v318_v29 = vld [vmem:[%s1138_s23 + $0x3b0] sm:$0xff]  ;;  %v319_v30 = vld [vmem:[%s1138_s23 + $0x3b8] sm:$0xff]  ;;  %v998_v32 = vpack.c.bf16 %v301_v27, %v300_v25  ;;  %v968_v33 = vpack.c.bf16 %v287_v2, %v286_v28  ;;  %v288_v39 = vld [vmem:[%s1138_s23 + $0x2c0] sm:$0xff]  ;;  %v329_v2 = vstv %s328_s24 }
  0x30   : > { %953 = vmatprep.subr.bf16.mxu1 %v952_v43  ;;  %v270_v34 = vld [vmem:[%s1138_s23 + $0x230] sm:$0xff]  ;;  %v271_v35 = vld [vmem:[%s1138_s23 + $0x238] sm:$0xff]  ;;  %v1000_v37 = vpack.c.bf16 %v319_v30, %v318_v29  ;;  %v289_v40 = vld [vmem:[%s1138_s23 + $0x2c8] sm:$0xff] }
  0x31   : > { %923 = vmatpush3.bf16.msra.mxu0 %v922_v50  ;;  %v302_v36 = vld [vmem:[%s1138_s23 + $0x330] sm:$0xff]  ;;  %v303_v38 = vld [vmem:[%s1138_s23 + $0x338] sm:$0xff]  ;;  %v320_v41 = vld [vmem:[%s1138_s23 + $0x3c0] sm:$0xff]  ;;  %v970_v43 = vpack.c.bf16 %v271_v35, %v270_v34  ;;  %v972_v45 = vpack.c.bf16 %v289_v40, %v288_v39 }
  0x32   : > { %957 = vmatprep.subr.bf16.mxu0 %v956_v53  ;;  %v321_v42 = vld [vmem:[%s1138_s23 + $0x3c8] sm:$0xff]  ;;  %v1002_v44 = vpack.c.bf16 %v303_v38, %v302_v36  ;;  %v272_v46 = vld [vmem:[%s1138_s23 + $0x240] sm:$0xff]  ;;  %v290_v51 = vld [vmem:[%s1138_s23 + $0x2d0] sm:$0xff] }
  0x33   : > { %955 = vmatpush3.bf16.msra.mxu1 %v954_v52  ;;  %v273_v47 = vld [vmem:[%s1138_s23 + $0x248] sm:$0xff]  ;;  %v304_v48 = vld [vmem:[%s1138_s23 + $0x340] sm:$0xff]  ;;  %v1004_v49 = vpack.c.bf16 %v321_v42, %v320_v41  ;;  %v291_v52 = vld [vmem:[%s1138_s23 + $0x2d8] sm:$0xff] }
  0x34   : > { %989 = vmatprep.subr.bf16.mxu1 %v988_v57  ;;  %436 = vmatmul.mubr.f32.vlgmr.msra.gmra.mrb[0].mxu0 %v334_v62  ;;  %v305_v50 = vld [vmem:[%s1138_s23 + $0x348] sm:$0xff]  ;;  %v322_v53 = vld [vmem:[%s1138_s23 + $0x3d0] sm:$0xff]  ;;  %v323_v54 = vld [vmem:[%s1138_s23 + $0x3d8] sm:$0xff]  ;;  %v974_v55 = vpack.c.bf16 %v273_v47, %v272_v46  ;;  %v976_v57 = vpack.c.bf16 %v291_v52, %v290_v51 }
  0x35   : > { %959 = vmatpush3.bf16.msra.mxu0 %v958_v4  ;;  %575 = vmatprep.mubr.f32.mxu0 %v354_v16  ;;  %v1006_v56 = vpack.c.bf16 %v305_v50, %v304_v48  ;;  %v274_v58 = vld [vmem:[%s1138_s23 + $0x250] sm:$0xff]  ;;  %v275_v59 = vld [vmem:[%s1138_s23 + $0x258] sm:$0xff]  ;;  %v1008_v61 = vpack.c.bf16 %v323_v54, %v322_v53  ;;  %v292_v63 = vld [vmem:[%s1138_s23 + $0x2e0] sm:$0xff] }
  0x36   : > { %506 = vmatmul.mubr.f32.vlgmr.msra.gmra.mrb[0].mxu1 %v342_v5  ;;  %961 = vmatprep.subr.bf16.mxu0 %v960_v7  ;;  %v306_v60 = vld [vmem:[%s1138_s23 + $0x350] sm:$0xff]  ;;  %v307_v62 = vld [vmem:[%s1138_s23 + $0x358] sm:$0xff]  ;;  %v293_v0 = vld [vmem:[%s1138_s23 + $0x2e8] sm:$0xff]  ;;  %v978_v5 = vpack.c.bf16 %v275_v59, %v274_v58 }
  0x37   : > { %991 = vmatpush3.bf16.msra.mxu1 %v990_v6  ;;  %645 = vmatprep.mubr.f32.mxu1 %v362_v19  ;;  %v324_v3 = vld [vmem:[%s1138_s23 + $0x3e0] sm:$0xff]  ;;  %v325_v4 = vld [vmem:[%s1138_s23 + $0x3e8] sm:$0xff]  ;;  %v1010_v6 = vpack.c.bf16 %v307_v62, %v306_v60  ;;  %v980_v7 = vpack.c.bf16 %v293_v0, %v292_v63  ;;  %v294_v15 = vld [vmem:[%s1138_s23 + $0x2f0] sm:$0xff] }
  0x38   : > { %993 = vmatprep.subr.bf16.mxu1 %v992_v11  ;;  %v276_v8 = vld [vmem:[%s1138_s23 + $0x260] sm:$0xff]  ;;  %v277_v9 = vld [vmem:[%s1138_s23 + $0x268] sm:$0xff]  ;;  %v1012_v11 = vpack.c.bf16 %v325_v4, %v324_v3  ;;  %v295_v1 = vld [vmem:[%s1138_s23 + $0x2f8] sm:$0xff] }
  0x39   : > { %963 = vmatpush3.bf16.msra.mxu0 %v962_v20  ;;  %v308_v10 = vld [vmem:[%s1138_s23 + $0x360] sm:$0xff]  ;;  %v309_v14 = vld [vmem:[%s1138_s23 + $0x368] sm:$0xff]  ;;  %v326_v16 = vld [vmem:[%s1138_s23 + $0x3f0] sm:$0xff]  ;;  %v982_v18 = vpack.c.bf16 %v277_v9, %v276_v8  ;;  %v984_v20 = vpack.c.bf16 %v295_v1, %v294_v15 }
  0x3a   : > { %965 = vmatprep.subr.bf16.mxu0 %v964_v22  ;;  %v327_v17 = vld [vmem:[%s1138_s23 + $0x3f8] sm:$0xff]  ;;  %v1014_v19 = vpack.c.bf16 %v309_v14, %v308_v10  ;;  %v310_v24 = vld [vmem:[%s1138_s23 + $0x370] sm:$0xff] }
  0x3b   : > { %995 = vmatpush3.bf16.msra.mxu1 %v994_v21  ;;  %v278_v21 = vld [vmem:[%s1138_s23 + $0x270] sm:$0xff]  ;;  %v279_v22 = vld [vmem:[%s1138_s23 + $0x278] sm:$0xff]  ;;  %v1016_v23 = vpack.c.bf16 %v327_v17, %v326_v16 }
  0x3c   : > { %997 = vmatprep.subr.bf16.mxu1 %v996_v26  ;;  %v311_v25 = vld [vmem:[%s1138_s23 + $0x378] sm:$0xff]  ;;  %v986_v26 = vpack.c.bf16 %v279_v22, %v278_v21 }
  0x3d   : > { %967 = vmatpush3.bf16.msra.mxu0 %v966_v31  ;;  %v1018_v27 = vpack.c.bf16 %v311_v25, %v310_v24 }
  0x3e   : > { %969 = vmatprep.subr.bf16.mxu0 %v968_v33 }
  0x3f   : > { %999 = vmatpush3.bf16.msra.mxu1 %v998_v32 }
  0x40   : > { %1001 = vmatprep.subr.bf16.mxu1 %v1000_v37 }
  0x41   : > { %971 = vmatpush3.bf16.msra.mxu0 %v970_v43 }
  0x42   : > { %973 = vmatprep.subr.bf16.mxu0 %v972_v45 }
  0x43   : > { %1003 = vmatpush3.bf16.msra.mxu1 %v1002_v44 }
  0x44   : > { %1005 = vmatprep.subr.bf16.mxu1 %v1004_v49 }
  0x45   : > { %975 = vmatpush3.bf16.msra.mxu0 %v974_v55 }
  0x46   : > { %977 = vmatprep.subr.bf16.mxu0 %v976_v57  ;;  %v1079_v57 = vmov 0.0  }
  0x47   : > { %1007 = vmatpush3.bf16.msra.mxu1 %v1006_v56  ;;  %198 = vst.msk [vmem:[%s192_s27] sm:$0x1] %vm197_vm2, %v1079_v57 }
  0x48   : > { %1009 = vmatprep.subr.bf16.mxu1 %v1008_v61 }
  0x49   : > { %979 = vmatpush3.bf16.msra.mxu0 %v978_v5 }
  0x4a   : > { %981 = vmatprep.subr.bf16.mxu0 %v980_v7 }
  0x4b   : > { %1011 = vmatpush3.bf16.msra.mxu1 %v1010_v6 }
  0x4c   : > { %1013 = vmatprep.subr.bf16.mxu1 %v1012_v11 }
  0x4d   : > { %983 = vmatpush3.bf16.msra.mxu0 %v982_v18 }
  0x4e   : > { %985 = vmatprep.subr.bf16.mxu0 %v984_v20  ;;  %v668_v3 = vld [vmem:[%s192_s27] sm:$0x1] }
  0x4f   : > { %1015 = vmatpush3.bf16.msra.mxu1 %v1014_v19 }
  0x50   : > { %1017 = vmatprep.subr.bf16.mxu1 %v1016_v23 }
  0x51   : > { %987 = vmatpush3.bf16.msra.mxu0 %v986_v26 }
  0x53   : > { %1019 = vmatpush3.bf16.msra.mxu1 %v1018_v27 }
  0x54   : > { %576 = vmatmul.mubr.f32.vlgmr.msra.gmra.mrb[2].mxu0 %v1146_v12 }
  0x56   : > { %646 = vmatmul.mubr.f32.vlgmr.msra.gmra.mrb[2].mxu1 %v1149_v13 }
 0x107   : > { %v784_v28 = vpop.f32.mrb[0].mxu0 }
 0x108   : > { %v785_v29 = vpop.f32.mrb[1].mxu0 }
 0x109   : > { %v819_v30 = vpop.f32.mrb[0].mxu1  ;;  %v786_v31 = vadd.f32 %v785_v29, %v784_v28 }
 0x10a   : > { %v820_v32 = vpop.f32.mrb[1].mxu1 }
 0x10b   : > { %v821_v33 = vadd.f32 %v820_v32, %v819_v30  ;;  %v438_v34 = vadd.f32 %v786_v31, %v329_v2 }
 0x10d   : > { %v508_v35 = vadd.f32 %v821_v33, %v438_v34 }
 0x127   : > { %v854_v36 = vpop.f32.mrb[2].mxu0 }
 0x128   : > { %v855_v37 = vpop.f32.mrb[3].mxu0 }
 0x129   : > { %v889_v38 = vpop.f32.mrb[2].mxu1  ;;  %v856_v39 = vadd.f32 %v855_v37, %v854_v36 }
 0x12a   : > { %v890_v40 = vpop.f32.mrb[3].mxu1 }
 0x12b   : > { %v891_v41 = vadd.f32 %v890_v40, %v889_v38  ;;  %v578_v42 = vadd.f32 %v856_v39, %v508_v35 }
 0x12d   : > { %v648_v12 = vadd.f32 %v891_v41, %v578_v42 }
 0x12f   : > { %v749_v43 = vmul.f32 -1.442695, %v648_v12 }
 0x131   : > { %1047 = vpow2.f32 %v749_v43 }
 0x13b   : > { %v1048_v13 = vpop.eup %1047 }
 0x13c   : > { %v654_v44 = vadd.f32 1.0, %v1048_v13 }
 0x13e   : > { %1049 = vrcp.f32 %v654_v44 }
 0x148   : > { %v1050_v45 = vpop.eup %1049 }
 0x149   : > { %v657_v46 = vmul.f32 1.442695, %v1050_v45 }
 0x14b   : > { %1051 = vpow2.f32 %v657_v46 }
 0x155   : > { %v1052_v47 = vpop.eup %1051 }
 0x156   : > { %v659_v48 = vadd.f32 1.0, %v1052_v47  ;;  %v662_v49 = vmul.f32 -0.5, %v1052_v47  ;;  %v665_v51 = vand.u32 2147483647, %v1052_v47 }
 0x158   : > { %1053 = vlog2.f32 %v659_v48  ;;  %v663_v50 = vadd.f32 1.0, %v662_v49  ;;  %vm666_vm1 = vcmp.lt.f32.partialorder %v665_v51, 0.0004427343 }
 0x15a   : > { %v664_v54 = vmul.f32 %v1052_v47, %v663_v50 }
 0x162   : > { %v1054_v52 = vpop.eup %1053 }
 0x163   : > { %v661_v53 = vmul.f32 0.6931472, %v1054_v52 }
 0x165   : > { %v667_v55 = vsel %vm666_vm1, %v664_v54, %v661_v53 }
 0x166   : > { %v670_v56 = vsel %vm669_vm0, %v667_v55, 0.0 }
 0x167   : > { %671 = vadd.xlane.f32.xlu0 %v670_v56 }
 0x1f4   : > { %v672_v58 = vpop.xlane.xlu0 %671 }
 0x1f5   : > { %v673_v59 = vrot.slane %v672_v58, 4 }
 0x1f7   : > { %v674_v60 = vadd.f32 %v673_v59, %v672_v58 }
 0x1f9   : > { %v675_v61 = vrot.slane %v674_v60, 2 }
 0x1fb   : > { %v676_v62 = vadd.f32 %v675_v61, %v674_v60 }
 0x1fd   : > { %v677_v63 = vrot.slane %v676_v62, 1 }
 0x1ff   : > { %v678_v0 = vadd.f32 %v677_v63, %v676_v62 }
 0x201   : > { %1020 = vpush %v678_v0 }
 0x232   : > { %s1021_s28 = spop %1020 }
 0x233   : > { %v680_v4 = vstv %s1021_s28 }
 0x234   : > { %v681_v5 = vadd.f32 %v680_v4, %v668_v3 }
 0x236   : > { %683 = vst.msk [vmem:[%s192_s27] sm:$0x1] %vm197_vm2, %v681_v5 }
 0x237 PF: > { %s14_s16 = sadd.s32 1, %s1077_s16   ;;  %s1306_s14 = smov %s1073_s15 }
 0x238   : > { %p11_p6 = scmp.ge.s32.totalorder %s14_s16, 4   ;;  %s1307_s15 = smov %s1309_s2 }
 0x23a   :  { %13 = sbr.rel (!%p11_p6) target bundleno = 2 (0x2), region = 66 }

</bundles_post_ra>
